<compile_context>
chip_gen: v7x
topology: tpu7x:2x2x1
jax: 0.10.0
libtpu: 0.0.40
codegen_flags: <defaults>
</compile_context>

<pallas_src>
import functools

import jax
import jax.numpy as jnp
import numpy as np
from jax.experimental import pallas as pl
from jax.experimental.pallas import tpu as pltpu

GAMMA_NEG = 1.0
GAMMA_POS = 1.0
CLIP = 0.05
EPS = 1e-8


def _bce_prob_clip_scaled_kernel(x_ref, y_ref, out_ref, *, num_classes,
                                 hard_labels):
    x = x_ref[...].astype(jnp.float32)
    y = y_ref[...].astype(jnp.float32)

    # sigmoid via a single EUP tanh push (vs exp + reciprocal).
    xs_pos = 0.5 * (1.0 + jnp.tanh(0.5 * x))
    xs_neg = jnp.minimum((1.0 - xs_pos) + CLIP, 1.0)   # prob clip + clamp(max=1)

    if hard_labels:
        # y in {0,1}: collapse the two logs into one and the asymmetric-weight
        # base into (1 - sel).  Saves one EUP log and ~5 VPU ops per element.
        sel = jnp.where(y > 0.5, xs_pos, xs_neg)
        loss = jnp.log(jnp.maximum(sel, EPS))
        if GAMMA_NEG > 0 or GAMMA_POS > 0:
            base = 1.0 - sel
            if GAMMA_POS == GAMMA_NEG:
                # constant exponent; gamma == 1 -> no pow at all
                w = base if GAMMA_POS == 1.0 else base ** jnp.float32(GAMMA_POS)
            else:
                w = jnp.power(base, jnp.where(y > 0.5,
                                              jnp.float32(GAMMA_POS),
                                              jnp.float32(GAMMA_NEG)))
            loss = loss * w
    else:
        # General (soft-label) path: faithful to the PyTorch formula.
        anti = 1.0 - y
        loss = (y * jnp.log(jnp.maximum(xs_pos, EPS))
                + anti * jnp.log(jnp.maximum(xs_neg, EPS)))
        if GAMMA_NEG > 0 or GAMMA_POS > 0:
            base = 1.0 - xs_pos * y - xs_neg * anti
            if GAMMA_POS == GAMMA_NEG:
                w = base if GAMMA_POS == 1.0 else base ** jnp.float32(GAMMA_POS)
            else:
                w = jnp.power(base, GAMMA_POS * y + GAMMA_NEG * anti)
            loss = loss * w

    # 3 cross-lane reductions (sum(1-y) = C - sum(y);
    # sum((1-y)*loss) = sum(loss) - sum(y*loss)).  1-D results are lane-major,
    # so the epilogue below runs on lane-dense vregs.
    s_y = jnp.sum(y, axis=1)                       # (tile_b,)
    s_yl = jnp.sum(y * loss, axis=1)
    s_l = jnp.sum(loss, axis=1)

    d_pos = s_y + EPS
    d_neg = (jnp.float32(num_classes) - s_y) + EPS
    # pos + neg = s_yl/d_pos + (s_l - s_yl)/d_neg, fused into a single divide.
    num = s_yl * d_neg + (s_l - s_yl) * d_pos
    out_ref[...] = (-(num / (d_pos * d_neg)))[None, :]   # lane-dense (1, tile_b)


def _round_up(v, m):
    return (v + m - 1) // m * m


def _vmem_params():
    # Generation-aware VMEM budgeting: 128 MiB physical (v5e/v6e) vs 64 MiB (v7x).
    try:
        cap = int(pltpu.get_tpu_info().vmem_capacity_bytes)
    except Exception:
        cap = 64 << 20
    if cap >= (128 << 20):
        return 40 << 20, 64 << 20      # budget, vmem_limit for v5e/v6e
    return 20 << 20, 32 << 20          # conservative for v7x


def _pick_tile_b(batch, num_classes, itemsize_x, itemsize_y, budget_bytes,
                 cap=4096):
    # Double-buffered inputs: 2 buffers x (x + y) rows per tile must fit budget.
    per_row = 2 * num_classes * (itemsize_x + itemsize_y)
    max_tile = max(128, budget_bytes // per_row // 128 * 128)
    b_pad = _round_up(batch, 128)
    tile = min(max_tile, cap, b_pad)
    if batch > 128:
        # Keep the grid at >= 2 steps so ("parallel",) can shard across both
        # v7x TensorCores (one extra cheap step on single-TC v5e/v6e).
        tile = min(tile, max(128, _round_up(pl.cdiv(batch, 2), 128)))
    return int(tile)


def bce_prob_clip_scaled(x, y, *, reduce="mean", hard_labels=True, tile_b=None):
    """BCEProbClipScaled forward.

    Returns a scalar for reduce='mean'/'sum', per-sample vector for 'none'.
    hard_labels=True enables the single-log fast path (valid for 0/1 targets);
    set False for soft labels.
    """
    B, C = x.shape
    assert y.shape == (B, C)

    budget, vmem_limit = _vmem_params()
    if tile_b is None:
        tile_b = _pick_tile_b(B, C, jnp.dtype(x.dtype).itemsize,
                              jnp.dtype(y.dtype).itemsize, budget)
    tile_b = int(_round_up(int(tile_b), 128))   # lane-dense output blocks
    num_tiles = pl.cdiv(B, tile_b)

    kernel = functools.partial(_bce_prob_clip_scaled_kernel,
                               num_classes=C, hard_labels=hard_labels)

    bytes_accessed = (x.size * jnp.dtype(x.dtype).itemsize
                      + y.size * jnp.dtype(y.dtype).itemsize
                      + B * 4)
    n_transc = 2 if hard_labels else 3          # tanh + log(s)
    cost = pl.CostEstimate(flops=12 * B * C,
                           transcendentals=n_transc * B * C,
                           bytes_accessed=int(bytes_accessed))

    out_row = pl.pallas_call(
        kernel,
        out_shape=jax.ShapeDtypeStruct((1, num_tiles * tile_b), jnp.float32),
        grid=(num_tiles,),
        in_specs=[
            pl.BlockSpec((tile_b, C), lambda i: (i, 0)),
            pl.BlockSpec((tile_b, C), lambda i: (i, 0)),
        ],
        out_specs=pl.BlockSpec((1, tile_b), lambda i: (0, i)),
        compiler_params=pltpu.CompilerParams(
            dimension_semantics=("parallel",),
            vmem_limit_bytes=vmem_limit),
        cost_estimate=cost,
    )(x, y)

    per_row = out_row[0, :B]     # padded lanes (ragged tail) are sliced away
    if reduce == "mean":
        return jnp.mean(per_row)
    if reduce == "sum":
        return jnp.sum(per_row)
    if reduce == "none":
        return per_row
    raise NotImplementedError(reduce)


def _reference(x, y, *, reduce="mean"):
    x = x.astype(jnp.float32)
    y = y.astype(jnp.float32)
    anti = 1.0 - y
    xs_pos = jax.nn.sigmoid(x)
    xs_neg = jnp.minimum(1.0 - xs_pos + CLIP, 1.0)
    loss = (y * jnp.log(jnp.maximum(xs_pos, EPS))
            + anti * jnp.log(jnp.maximum(xs_neg, EPS)))
    if GAMMA_NEG > 0 or GAMMA_POS > 0:
        w = jnp.power(1.0 - xs_pos * y - xs_neg * anti,
                      GAMMA_POS * y + GAMMA_NEG * anti)
        loss = loss * w
    pos = jnp.sum(y * loss, axis=1) / (jnp.sum(y, axis=1) + EPS)
    neg = jnp.sum(anti * loss, axis=1) / (jnp.sum(anti, axis=1) + EPS)
    out = -(pos + neg)
    if reduce == "mean":
        return jnp.mean(out)
    if reduce == "sum":
        return jnp.sum(out)
    return out


if __name__ == "__main__":
    key = jax.random.PRNGKey(0)
    kx, ky = jax.random.split(key)

    # Tolerances account for the tanh-form sigmoid vs expit (sub-1e-5 relative).
    RTOL, ATOL = 1e-4, 1e-5

    # Small multi-label problem: 16 samples, 128 classes, hard 0/1 targets.
    B, C = 16, 128
    x = jax.random.normal(kx, (B, C), dtype=jnp.float32)             # logits
    y = (jax.random.uniform(ky, (B, C)) < 0.3).astype(jnp.float32)   # 0/1 targets

    out = jax.block_until_ready(bce_prob_clip_scaled(x, y))
    ref = jax.block_until_ready(_reference(x, y))
    np.testing.assert_allclose(np.asarray(out), np.asarray(ref),
                               rtol=RTOL, atol=ATOL)

    # Ragged batch (partial last tile; padded lanes are sliced off in wrapper).
    B2 = 13
    x2 = jax.random.normal(kx, (B2, C), dtype=jnp.float32)
    y2 = (jax.random.uniform(ky, (B2, C)) < 0.3).astype(jnp.float32)
    out2 = jax.block_until_ready(bce_prob_clip_scaled(x2, y2))
    ref2 = jax.block_until_ready(_reference(x2, y2))
    np.testing.assert_allclose(np.asarray(out2), np.asarray(ref2),
                               rtol=RTOL, atol=ATOL)

    # Soft-label path (hard_labels=False) for full generality.
    ysoft = jax.random.uniform(ky, (B, C), dtype=jnp.float32)
    out3 = jax.block_until_ready(
        bce_prob_clip_scaled(x, ysoft, hard_labels=False))
    ref3 = jax.block_until_ready(_reference(x, ysoft))
    np.testing.assert_allclose(np.asarray(out3), np.asarray(ref3),
                               rtol=RTOL, atol=ATOL)

    print("KERNEL_OK")
</pallas_src>

<mosaic_0001>
module attributes {stable_mosaic.version = 11 : i64} {
  func.func @_bce_prob_clip_scaled_kernel(%arg0: i32, %arg1: memref<128x128xf32, #tpu.memory_space<vmem>>, %arg2: memref<128x128xf32, #tpu.memory_space<vmem>>, %arg3: memref<1x128xf32, #tpu.memory_space<vmem>>) attributes {dimension_semantics = [#tpu.dimension_semantics<parallel>], iteration_bounds = array<i64: 1>, scalar_prefetch = 0 : i64, scratch_operands = 0 : i64, tpu.core_type = #tpu.core_type<tc>, window_params = [{transform_indices = @transform_0, window_bounds = array<i64: 128, 128>}, {transform_indices = @transform_1, window_bounds = array<i64: 128, 128>}, {transform_indices = @transform_2, window_bounds = array<i64: 1, 128>}]} {
    %c0 = arith.constant 0 : index
    %c0_0 = arith.constant 0 : index
    %0 = vector.load %arg1[%c0, %c0_0] : memref<128x128xf32, #tpu.memory_space<vmem>>, vector<128x128xf32>
    %c0_1 = arith.constant 0 : index
    %c0_2 = arith.constant 0 : index
    %1 = vector.load %arg2[%c0_1, %c0_2] : memref<128x128xf32, #tpu.memory_space<vmem>>, vector<128x128xf32>
    %cst = arith.constant 5.000000e-01 : f32
    %2 = vector.broadcast %cst : f32 to vector<128x128xf32>
    %3 = arith.mulf %2, %0 : vector<128x128xf32>
    %4 = math.tanh %3 : vector<128x128xf32>
    %cst_3 = arith.constant 1.000000e+00 : f32
    %5 = vector.broadcast %cst_3 : f32 to vector<128x128xf32>
    %6 = arith.addf %5, %4 : vector<128x128xf32>
    %cst_4 = arith.constant 5.000000e-01 : f32
    %7 = vector.broadcast %cst_4 : f32 to vector<128x128xf32>
    %8 = arith.mulf %7, %6 : vector<128x128xf32>
    %cst_5 = arith.constant 1.000000e+00 : f32
    %9 = vector.broadcast %cst_5 : f32 to vector<128x128xf32>
    %10 = arith.subf %9, %8 : vector<128x128xf32>
    %cst_6 = arith.constant 5.000000e-02 : f32
    %11 = vector.broadcast %cst_6 : f32 to vector<128x128xf32>
    %12 = arith.addf %10, %11 : vector<128x128xf32>
    %cst_7 = arith.constant 1.000000e+00 : f32
    %13 = vector.broadcast %cst_7 : f32 to vector<128x128xf32>
    %14 = arith.minimumf %12, %13 : vector<128x128xf32>
    %cst_8 = arith.constant 5.000000e-01 : f32
    %15 = vector.broadcast %cst_8 : f32 to vector<128x128xf32>
    %16 = arith.cmpf ogt, %1, %15 : vector<128x128xf32>
    %17 = arith.select %16, %8, %14 : vector<128x128xi1>, vector<128x128xf32>
    %cst_9 = arith.constant 9.99999993E-9 : f32
    %18 = vector.broadcast %cst_9 : f32 to vector<128x128xf32>
    %19 = arith.maximumf %17, %18 : vector<128x128xf32>
    %20 = math.log %19 : vector<128x128xf32>
    %cst_10 = arith.constant 1.000000e+00 : f32
    %21 = vector.broadcast %cst_10 : f32 to vector<128x128xf32>
    %22 = arith.subf %21, %17 : vector<128x128xf32>
    %23 = arith.mulf %20, %22 : vector<128x128xf32>
    %cst_11 = arith.constant dense<0.000000e+00> : vector<128xf32>
    %24 = vector.multi_reduction <add>, %1, %cst_11 [1] : vector<128x128xf32> to vector<128xf32>
    %25 = arith.mulf %1, %23 : vector<128x128xf32>
    %cst_12 = arith.constant dense<0.000000e+00> : vector<128xf32>
    %26 = vector.multi_reduction <add>, %25, %cst_12 [1] : vector<128x128xf32> to vector<128xf32>
    %cst_13 = arith.constant dense<0.000000e+00> : vector<128xf32>
    %27 = vector.multi_reduction <add>, %23, %cst_13 [1] : vector<128x128xf32> to vector<128xf32>
    %cst_14 = arith.constant 9.99999993E-9 : f32
    %28 = vector.broadcast %cst_14 : f32 to vector<128xf32>
    %29 = arith.addf %24, %28 : vector<128xf32>
    %cst_15 = arith.constant 1.280000e+02 : f32
    %30 = vector.broadcast %cst_15 : f32 to vector<128xf32>
    %31 = arith.subf %30, %24 : vector<128xf32>
    %cst_16 = arith.constant 9.99999993E-9 : f32
    %32 = vector.broadcast %cst_16 : f32 to vector<128xf32>
    %33 = arith.addf %31, %32 : vector<128xf32>
    %34 = arith.mulf %26, %33 : vector<128xf32>
    %35 = arith.subf %27, %26 : vector<128xf32>
    %36 = arith.mulf %35, %29 : vector<128xf32>
    %37 = arith.addf %34, %36 : vector<128xf32>
    %38 = arith.mulf %29, %33 : vector<128xf32>
    %39 = arith.divf %37, %38 : vector<128xf32>
    %cst_17 = arith.constant 0.000000e+00 : f32
    %40 = vector.broadcast %cst_17 : f32 to vector<128xf32>
    %41 = arith.subf %40, %39 : vector<128xf32>
    %42 = vector.shape_cast %41 : vector<128xf32> to vector<1x128xf32>
    %c0_18 = arith.constant 0 : index
    %c0_19 = arith.constant 0 : index
    %43 = vector.load %arg3[%c0_18, %c0_19] : memref<1x128xf32, #tpu.memory_space<vmem>>, vector<1x128xf32>
    tpu.vector_store %arg3[%c0_18, %c0_19], %42 {strides = array<i32>} : memref<1x128xf32, #tpu.memory_space<vmem>>, vector<1x128xf32>,
    return
  }
  func.func @transform_0(%arg0: i32) -> (i32, i32) {
    %c0_i32 = arith.constant 0 : i32
    %c0_i32_0 = arith.constant 0 : i32
    return %arg0, %c0_i32 : i32, i32
  }
  func.func @transform_1(%arg0: i32) -> (i32, i32) {
    %c0_i32 = arith.constant 0 : i32
    %c0_i32_0 = arith.constant 0 : i32
    return %arg0, %c0_i32 : i32, i32
  }
  func.func @transform_2(%arg0: i32) -> (i32, i32) {
    %c0_i32 = arith.constant 0 : i32
    %c0_i32_0 = arith.constant 0 : i32
    return %c0_i32, %arg0 : i32, i32
  }
}

</mosaic_0001>

<bundles_post_ra>
// kernel: tpu_custom_call.1
= control target key start
LH: loop header
LB: loop body
LE: loop exit
PB: predicated region body
PF: predicated region fallthrough
CT: control target
= control target key end

     0   :  { %7 = vsyncpa [#allocation3], 0  ;;  %s1324_s0 = inlined_call_operand.hbm [shape: f32[16,128], index: 0, kind: input, shape index: {}]   ;;  %s1325_s1 = inlined_call_operand.hbm [shape: f32[16,128], index: 1, kind: input, shape index: {}]   ;;  %s1326_s2 = inlined_call_operand.hbm [shape: f32[1,128], index: 2, kind: output, shape index: {}]  }
   0x1   :  { %8 = vsyncpa [#allocation6], 0 }
   0x2   :  { %9 = vsyncpa [#allocation4], 0 }
   0x3   :  { %14 = vsyncadd [#allocation3], 1792  ;;  %s902_s9 = smov [#allocation2]   ;;  %s830_s13 = scalar_lea.hbm %s1324_s0, 256 }
   0x4   :  { %s15_s10 = sshll.u32 %s902_s9, 4  ;;  %p831_p0 = scmp.ne.s32.totalorder %s1324_s0, %s830_s13  ;;  %s16_s10 = int_to_ptr.vmem [resolvable:$true] %s15_s10 }
   0x5   :  { %p834_p1 = scmp.lt.u32.totalorder %s830_s13, %s1324_s0 }
   0x7   :  { %p836_p2 = pnand %p834_p1, %p831_p0 }
   0x9   :  { %839 = shalt.err (!%p836_p2)
}
   0xa   :  { %s840_s18 = scalar_lea.vmem %s16_s10, 256  ;;  %s844_s19 = scalar_lea.vmem %s16_s10, 2048 }
   0xb   :  { %p841_p3 = scmp.ne.s32.totalorder %s16_s10, %s840_s18  ;;  %p845_p4 = scmp.lt.s32.totalorder %s16_s10, %s16_s10 }
   0xc   :  { %p846_p5 = scmp.lt.s32.totalorder %s844_s19, %s840_s18 }
   0xe   :  { %p847_p6 = por %p846_p5, %p845_p4 }
  0x10   :  { %p848_p7 = pnand %p847_p6, %p841_p3 }
  0x12   :  { %851 = shalt.err (!%p848_p7)
}
  0x13   :  { %s903_s20 = smov 128   ;;  %s904_s21 = smov 8  }
  0x14   :  { %21 = dma.hbm_to_vmem [thread:$0]  %s1324_s0, 256, %s16_s10, [#allocation3], %s903_s20, %s903_s20, %s904_s21  }
  0x15   :  { %26 = vsyncadd [#allocation6], 1792  ;;  %s905_s24 = smov [#allocation5]   ;;  %s852_s28 = scalar_lea.hbm %s1325_s1, 256 }
  0x16   :  { %s27_s25 = sshll.u32 %s905_s24, 4  ;;  %p853_p8 = scmp.ne.s32.totalorder %s1325_s1, %s852_s28  ;;  %s28_s25 = int_to_ptr.vmem [resolvable:$true] %s27_s25 }
  0x17   :  { %p856_p9 = scmp.lt.u32.totalorder %s852_s28, %s1325_s1 }
  0x19   :  { %p858_p10 = pnand %p856_p9, %p853_p8 }
  0x1b   :  { %861 = shalt.err (!%p858_p10)
}
  0x1c   :  { %s862_s5 = scalar_lea.vmem %s28_s25, 256  ;;  %s866_s0 = scalar_lea.vmem %s28_s25, 2048 }
  0x1d   :  { %p863_p11 = scmp.ne.s32.totalorder %s28_s25, %s862_s5  ;;  %p867_p12 = scmp.lt.s32.totalorder %s28_s25, %s28_s25 }
  0x1e   :  { %p868_p13 = scmp.lt.s32.totalorder %s866_s0, %s862_s5 }
  0x20   :  { %p869_p0 = por %p868_p13, %p867_p12 }
  0x22   :  { %p870_p1 = pnand %p869_p0, %p863_p11 }
  0x24   :  { %873 = shalt.err (!%p870_p1)
}
  0x25   :  { %33 = dma.hbm_to_vmem [thread:$0]  %s1325_s1, 256, %s28_s25, [#allocation6], %s903_s20, %s903_s20, %s904_s21  }
  0x26   :  { %896 = dma.done.wait [#allocation3], 2048  }
  0x27   :  { %897 = vsyncadd [#allocation3], 4294965248 }
  0x28   :  { %898 = dma.done.wait [#allocation6], 2048  }
  0x29   :  { %899 = vsyncadd [#allocation6], 4294965248  ;;  %v946_v0 = vld [vmem:[#allocation5 + $0x10] sm:$0xff]  ;;  %v948_v1 = vld [vmem:[#allocation5] sm:$0xff]  ;;  %s906_s1 = smov [#allocation7]  }
  0x2a   :  { %300 = vadd.xlane.f32.xlu1 %v946_v0  ;;  %296 = vadd.xlane.f32.xlu0 %v948_v1  ;;  %v952_v2 = vld [vmem:[#allocation5 + $0x18] sm:$0xff]  ;;  %v954_v3 = vld [vmem:[#allocation5 + $0x8] sm:$0xff]  ;;  %v960_v5 = vld [vmem:[#allocation5 + $0x20] sm:$0xff]  ;;  %vm184_vm0 = vcmp.gt.f32.partialorder %v948_v1, 0.5  ;;  %vm186_vm1 = vcmp.gt.f32.partialorder %v946_v0, 0.5  ;;  %s719_s8 = sshll.u32 %s906_s1, 4  ;;  %s720_s8 = int_to_ptr.vmem [resolvable:$true] %s719_s8 }
  0x2b   :  { %v958_v4 = vld [vmem:[#allocation5 + $0x28] sm:$0xff]  ;;  %v964_v7 = vld [vmem:[#allocation5 + $0x38] sm:$0xff]  ;;  %v966_v8 = vld [vmem:[#allocation5 + $0x30] sm:$0xff]  ;;  %vm187_vm2 = vcmp.gt.f32.partialorder %v952_v2, 0.5  ;;  %vm185_vm3 = vcmp.gt.f32.partialorder %v954_v3, 0.5  ;;  %vm188_vm6 = vcmp.gt.f32.partialorder %v960_v5, 0.5  ;;  %p879_p3 = scmp.lt.s32.totalorder %s720_s8, %s720_s8 }
  0x2c   :  { %v45_v6 = vld [vmem:[#allocation2 + $0x28] sm:$0xff]  ;;  %v47_v9 = vld [vmem:[#allocation2 + $0x38] sm:$0xff]  ;;  %v46_v11 = vld [vmem:[#allocation2 + $0x30] sm:$0xff]  ;;  %vm189_vm4 = vcmp.gt.f32.partialorder %v958_v4, 0.5  ;;  %vm190_vm5 = vcmp.gt.f32.partialorder %v966_v8, 0.5  ;;  %vm191_vm7 = vcmp.gt.f32.partialorder %v964_v7, 0.5 }
  0x2d   :  { %v77_v10 = vmul.f32 0.5, %v45_v6  ;;  %v41_v12 = vld [vmem:[#allocation2 + $0x8] sm:$0xff]  ;;  %v79_v13 = vmul.f32 0.5, %v47_v9  ;;  %v972_v15 = vld [vmem:[#allocation5 + $0x40] sm:$0xff]  ;;  %v78_v17 = vmul.f32 0.5, %v46_v11  ;;  %v43_v18 = vld [vmem:[#allocation2 + $0x18] sm:$0xff] }
  0x2e   :  { %302 = vadd.xlane.f32.xlu1 %v952_v2  ;;  %298 = vadd.xlane.f32.xlu0 %v954_v3  ;;  %v970_v14 = vld [vmem:[#allocation5 + $0x48] sm:$0xff]  ;;  %v40_v16 = vld [vmem:[#allocation2] sm:$0xff]  ;;  %v73_v19 = vmul.f32 0.5, %v41_v12  ;;  %v42_v20 = vld [vmem:[#allocation2 + $0x10] sm:$0xff]  ;;  %v75_v24 = vmul.f32 0.5, %v43_v18  ;;  %vm192_vm8 = vcmp.gt.f32.partialorder %v972_v15, 0.5 }
  0x2f   :  { %734 = vtanh.f32 %v77_v10  ;;  %v72_v21 = vmul.f32 0.5, %v40_v16  ;;  %v976_v22 = vld [vmem:[#allocation5 + $0x58] sm:$0xff]  ;;  %v978_v23 = vld [vmem:[#allocation5 + $0x50] sm:$0xff]  ;;  %v49_v25 = vld [vmem:[#allocation2 + $0x48] sm:$0xff]  ;;  %v74_v26 = vmul.f32 0.5, %v42_v20  ;;  %vm193_vm9 = vcmp.gt.f32.partialorder %v970_v14, 0.5 }
  0x30   :  { %736 = vtanh.f32 %v79_v13  ;;  %v48_v27 = vld [vmem:[#allocation2 + $0x40] sm:$0xff]  ;;  %v81_v28 = vmul.f32 0.5, %v49_v25  ;;  %v982_v29 = vld [vmem:[#allocation5 + $0x68] sm:$0xff]  ;;  %v50_v33 = vld [vmem:[#allocation2 + $0x50] sm:$0xff]  ;;  %vm194_vm10 = vcmp.gt.f32.partialorder %v978_v23, 0.5  ;;  %vm195_vm11 = vcmp.gt.f32.partialorder %v976_v22, 0.5 }
  0x31   :  { %738 = vtanh.f32 %v78_v17  ;;  %v984_v30 = vld [vmem:[#allocation5 + $0x60] sm:$0xff]  ;;  %v80_v32 = vmul.f32 0.5, %v48_v27  ;;  %v988_v36 = vld [vmem:[#allocation5 + $0x78] sm:$0xff]  ;;  %v990_v37 = vld [vmem:[#allocation5 + $0x70] sm:$0xff]  ;;  %v82_v39 = vmul.f32 0.5, %v50_v33  ;;  %vm197_vm13 = vcmp.gt.f32.partialorder %v982_v29, 0.5 }
  0x32   :  { %306 = vadd.xlane.f32.xlu1 %v958_v4  ;;  %304 = vadd.xlane.f32.xlu0 %v960_v5  ;;  %740 = vtanh.f32 %v73_v19  ;;  %v44_v31 = vld [vmem:[#allocation2 + $0x20] sm:$0xff]  ;;  %v51_v43 = vld [vmem:[#allocation2 + $0x58] sm:$0xff]  ;;  %v53_v51 = vld [vmem:[#allocation2 + $0x68] sm:$0xff]  ;;  %vm196_vm12 = vcmp.gt.f32.partialorder %v984_v30, 0.5  ;;  %vm198_vm14 = vcmp.gt.f32.partialorder %v990_v37, 0.5  ;;  %vm199_vm15 = vcmp.gt.f32.partialorder %v988_v36, 0.5 }
  0x33   :  { %742 = vtanh.f32 %v72_v21  ;;  %v76_v34 = vmul.f32 0.5, %v44_v31  ;;  %v83_v48 = vmul.f32 0.5, %v51_v43  ;;  %v52_v57 = vld [vmem:[#allocation2 + $0x60] sm:$0xff]  ;;  %v85_v62 = vmul.f32 0.5, %v53_v51  ;;  %v54_v9 = vld [vmem:[#allocation2 + $0x70] sm:$0xff]  ;;  %s874_s9 = scalar_lea.vmem %s720_s8, 16 }
  0x34   :  { %744 = vtanh.f32 %v75_v24  ;;  %v84_v18 = vmul.f32 0.5, %v52_v57  ;;  %v86_v27 = vmul.f32 0.5, %v54_v9  ;;  %p875_p2 = scmp.ne.s32.totalorder %s720_s8, %s874_s9  ;;  %s878_s10 = scalar_lea.vmem %s720_s8, 32 }
  0x35   :  { %746 = vtanh.f32 %v74_v26  ;;  %p880_p4 = scmp.lt.s32.totalorder %s878_s10, %s874_s9 }
  0x36   :  { %310 = vadd.xlane.f32.xlu1 %v964_v7  ;;  %308 = vadd.xlane.f32.xlu0 %v966_v8  ;;  %748 = vtanh.f32 %v81_v28 }
  0x37   :  { %750 = vtanh.f32 %v80_v32  ;;  %p881_p5 = por %p880_p4, %p879_p3 }
  0x38   :  { %752 = vtanh.f32 %v76_v34 }
  0x39   :  { %v735_v35 = vpop.eup %734  ;;  %754 = vtanh.f32 %v82_v39  ;;  %p882_p6 = pnand %p881_p5, %p875_p2 }
  0x3a   :  { %314 = vadd.xlane.f32.xlu1 %v970_v14  ;;  %312 = vadd.xlane.f32.xlu0 %v972_v15  ;;  %v737_v38 = vpop.eup %736  ;;  %v109_v41 = vadd.f32 1.0, %v735_v35  ;;  %756 = vtanh.f32 %v83_v48 }
  0x3b   :  { %v739_v40 = vpop.eup %738  ;;  %v111_v53 = vadd.f32 1.0, %v737_v38  ;;  %758 = vtanh.f32 %v85_v62 }
  0x3c   :  { %v741_v42 = vpop.eup %740  ;;  %v994_v47 = vmul.f32 0.5, %v109_v41  ;;  %v110_v50 = vadd.f32 1.0, %v739_v40  ;;  %760 = vtanh.f32 %v84_v18 }
  0x3d   :  { %v743_v44 = vpop.eup %742  ;;  %v105_v49 = vadd.f32 1.0, %v741_v42  ;;  %v1003_v16 = vmul.f32 0.5, %v111_v53 }
  0x3e   :  { %318 = vadd.xlane.f32.xlu1 %v976_v22  ;;  %316 = vadd.xlane.f32.xlu0 %v978_v23  ;;  %v745_v45 = vpop.eup %744  ;;  %v104_v52 = vadd.f32 1.0, %v743_v44  ;;  %v141_v61 = vsub.f32 1.0, %v994_v47  ;;  %v1001_v6 = vmul.f32 0.5, %v110_v50 }
  0x3f   :  { %v747_v46 = vpop.eup %746  ;;  %v121_v54 = vmul.f32 0.5, %v105_v49  ;;  %v107_v55 = vadd.f32 1.0, %v745_v45  ;;  %v143_v38 = vsub.f32 1.0, %v1003_v16  ;;  %v55_v45 = vld [vmem:[#allocation2 + $0x78] sm:$0xff] }
  0x40   :  { %v749_v56 = vpop.eup %748  ;;  %v120_v58 = vmul.f32 0.5, %v104_v52  ;;  %v106_v59 = vadd.f32 1.0, %v747_v46  ;;  %v157_v26 = vadd.f32 0.05, %v141_v61  ;;  %v142_v32 = vsub.f32 1.0, %v1001_v6 }
  0x41   :  { %v751_v60 = vpop.eup %750  ;;  %v137_v63 = vsub.f32 1.0, %v121_v54  ;;  %v123_v11 = vmul.f32 0.5, %v107_v55  ;;  %v113_v17 = vadd.f32 1.0, %v749_v56  ;;  %v159_v55 = vadd.f32 0.05, %v143_v38 }
  0x42   :  { %322 = vadd.xlane.f32.xlu1 %v982_v29  ;;  %320 = vadd.xlane.f32.xlu0 %v984_v30  ;;  %v136_v10 = vsub.f32 1.0, %v120_v58  ;;  %v122_v12 = vmul.f32 0.5, %v106_v59  ;;  %v753_v13 = vpop.eup %752  ;;  %v112_v20 = vadd.f32 1.0, %v751_v60  ;;  %v173_v50 = vmin.f32 %v157_v26, 1.0 }
  0x43   :  { %v153_v19 = vadd.f32 0.05, %v137_v63  ;;  %v139_v24 = vsub.f32 1.0, %v123_v11  ;;  %v755_v31 = vpop.eup %754  ;;  %v108_v35 = vadd.f32 1.0, %v753_v13  ;;  %v1012_v41 = vmul.f32 0.5, %v113_v17 }
  0x44   :  { %v152_v21 = vadd.f32 0.05, %v136_v10  ;;  %v138_v25 = vsub.f32 1.0, %v122_v12  ;;  %v1014_v42 = vmul.f32 0.5, %v112_v20  ;;  %v114_v44 = vadd.f32 1.0, %v755_v31 }
  0x45   :  { %v169_v28 = vmin.f32 %v153_v19, 1.0  ;;  %v155_v34 = vadd.f32 0.05, %v139_v24  ;;  %v158_v51 = vadd.f32 0.05, %v142_v32  ;;  %v124_v53 = vmul.f32 0.5, %v108_v35 }
  0x46   :  { %326 = vadd.xlane.f32.xlu1 %v988_v36  ;;  %324 = vadd.xlane.f32.xlu0 %v990_v37  ;;  %v168_v33 = vmin.f32 %v152_v21, 1.0  ;;  %v154_v40 = vadd.f32 0.05, %v138_v25  ;;  %v87_v61 = vmul.f32 0.5, %v55_v45  ;;  %v1037_v63 = vsel %vm189_vm4, %v994_v47, %v173_v50 }
  0x47   :  { %v1010_v39 = vsel %vm185_vm3, %v121_v54, %v169_v28  ;;  %v171_v48 = vmin.f32 %v155_v34, 1.0  ;;  %v757_v54 = vpop.eup %756  ;;  %v140_v62 = vsub.f32 1.0, %v124_v53  ;;  %v174_v9 = vmin.f32 %v158_v51, 1.0 }
  0x48   :  { %v217_v43 = vmax.f32 %v1010_v39, 1e-08  ;;  %v1019_v46 = vsel %vm184_vm0, %v120_v58, %v168_v33  ;;  %v170_v49 = vmin.f32 %v154_v40, 1.0  ;;  %v144_v58 = vsub.f32 1.0, %v1014_v42  ;;  %v759_v19 = vpop.eup %758 }
  0x49   :  { %v216_v52 = vmax.f32 %v1019_v46, 1e-08  ;;  %v1024_v56 = vsel %vm187_vm2, %v123_v11, %v171_v48  ;;  %v115_v10 = vadd.f32 1.0, %v757_v54  ;;  %v145_v11 = vsub.f32 1.0, %v1012_v41  ;;  %v761_v21 = vpop.eup %760 }
  0x4a   :  { %762 = vlog2.f32 %v217_v43  ;;  %v1028_v57 = vsel %vm186_vm1, %v122_v12, %v170_v49  ;;  %v219_v59 = vmax.f32 %v1024_v56, 1e-08  ;;  %v1040_v12 = vmul.f32 0.5, %v114_v44 }
  0x4b   :  { %764 = vlog2.f32 %v216_v52  ;;  %v218_v60 = vmax.f32 %v1028_v57, 1e-08  ;;  %v156_v13 = vadd.f32 0.05, %v140_v62  ;;  %v175_v17 = vmin.f32 %v159_v55, 1.0 }
  0x4c   :  { %766 = vlog2.f32 %v219_v59  ;;  %v160_v18 = vadd.f32 0.05, %v144_v58  ;;  %v221_v20 = vmax.f32 %v1037_v63, 1e-08  ;;  %v1048_v24 = vsel %vm190_vm5, %v1001_v6, %v174_v9 }
  0x4d   :  { %768 = vlog2.f32 %v218_v60  ;;  %v172_v47 = vmin.f32 %v156_v13, 1.0  ;;  %v1051_v25 = vmul.f32 0.5, %v115_v10  ;;  %v161_v26 = vadd.f32 0.05, %v145_v11 }
  0x4e   :  { %770 = vtanh.f32 %v86_v27  ;;  %v146_v28 = vsub.f32 1.0, %v1040_v12  ;;  %v1057_v31 = vsel %vm191_vm7, %v1003_v16, %v175_v17  ;;  %v176_v32 = vmin.f32 %v160_v18, 1.0 }
  0x4f   :  { %772 = vtanh.f32 %v87_v61  ;;  %v1054_v27 = vsel %vm188_vm6, %v124_v53, %v172_v47  ;;  %v265_v33 = vsub.f32 1.0, %v1010_v39  ;;  %v222_v35 = vmax.f32 %v1048_v24, 1e-08 }
  0x50   :  { %v220_v34 = vmax.f32 %v1054_v27, 1e-08  ;;  %774 = vlog2.f32 %v221_v20  ;;  %v116_v38 = vadd.f32 1.0, %v761_v21  ;;  %v264_v40 = vsub.f32 1.0, %v1019_v46 }
  0x51   :  { %v147_v44 = vsub.f32 1.0, %v1051_v25  ;;  %v117_v45 = vadd.f32 1.0, %v759_v19  ;;  %v223_v16 = vmax.f32 %v1057_v31, 1e-08  ;;  %v177_v49 = vmin.f32 %v161_v26, 1.0 }
  0x52   :  { %776 = vlog2.f32 %v220_v34  ;;  %v267_v39 = vsub.f32 1.0, %v1024_v56  ;;  %v1069_v52 = vsel %vm192_vm8, %v1014_v42, %v176_v32  ;;  %v162_v53 = vadd.f32 0.05, %v146_v28 }
  0x53   :  { %v266_v54 = vsub.f32 1.0, %v1028_v57  ;;  %778 = vlog2.f32 %v222_v35  ;;  %v1072_v58 = vmul.f32 0.5, %v116_v38  ;;  %v163_v62 = vadd.f32 0.05, %v147_v44 }
  0x54   :  { %v763_v6 = vpop.eup %762  ;;  %v224_v9 = vmax.f32 %v1069_v52, 1e-08  ;;  %v178_v10 = vmin.f32 %v162_v53, 1.0  ;;  %v1077_v57 = vmul.f32 0.5, %v117_v45  ;;  %780 = vlog2.f32 %v223_v16 }
  0x55   :  { %v765_v43 = vpop.eup %764  ;;  %v235_v48 = vmul.f32 0.6931472, %v763_v6  ;;  %v1080_v17 = vsel %vm193_vm9, %v1012_v41, %v177_v49  ;;  %v148_v18 = vsub.f32 1.0, %v1072_v58  ;;  %v179_v21 = vmin.f32 %v163_v62, 1.0 }
  0x56   :  { %v233_v50 = vmul.f32 0.6931472, %v765_v43  ;;  %v767_v51 = vpop.eup %766  ;;  %v268_v26 = vsub.f32 1.0, %v1054_v27  ;;  %v225_v32 = vmax.f32 %v1080_v17, 1e-08  ;;  %782 = vlog2.f32 %v224_v9 }
  0x57   :  { %v281_v46 = vmul.f32 %v265_v33, %v235_v48  ;;  %v769_v55 = vpop.eup %768  ;;  %v239_v60 = vmul.f32 0.6931472, %v767_v51  ;;  %v1090_v41 = vsel %vm194_vm10, %v1040_v12, %v178_v10  ;;  %v149_v33 = vsub.f32 1.0, %v1077_v57 }
  0x58   :  { %v280_v59 = vmul.f32 %v264_v40, %v233_v50  ;;  %v771_v61 = vpop.eup %770  ;;  %v237_v56 = vmul.f32 0.6931472, %v769_v55  ;;  %v164_v34 = vadd.f32 0.05, %v148_v18  ;;  %v269_v27 = vsub.f32 1.0, %v1037_v63 }
  0x59   :  { %378 = vadd.xlane.f32.xlu0 %v281_v46  ;;  %v283_v42 = vmul.f32 %v267_v39, %v239_v60  ;;  %v773_v13 = vpop.eup %772  ;;  %v118_v19 = vadd.f32 1.0, %v771_v61  ;;  %v329_v20 = vmul.f32 %v281_v46, %v954_v3  ;;  %784 = vlog2.f32 %v225_v32 }
  0x5a   :  { %376 = vadd.xlane.f32.xlu1 %v280_v59  ;;  %v282_v11 = vmul.f32 %v266_v54, %v237_v56  ;;  %v775_v47 = vpop.eup %774  ;;  %v119_v3 = vadd.f32 1.0, %v773_v13  ;;  %v1099_v12 = vsel %vm195_vm11, %v1051_v25, %v179_v21  ;;  %v226_v45 = vmax.f32 %v1090_v41, 1e-08 }
  0x5b   :  { %v134_v6 = vmul.f32 0.5, %v118_v19  ;;  %v243_v40 = vmul.f32 0.6931472, %v775_v47  ;;  %v165_v48 = vadd.f32 0.05, %v149_v33  ;;  %v180_v16 = vmin.f32 %v164_v34, 1.0 }
  0x5c   :  { %v777_v28 = vpop.eup %776  ;;  %v330_v38 = vmul.f32 %v282_v11, %v946_v0  ;;  %v135_v49 = vmul.f32 0.5, %v119_v3  ;;  %v328_v0 = vmul.f32 %v280_v59, %v948_v1  ;;  %v270_v53 = vsub.f32 1.0, %v1048_v24 }
  0x5d   :  { %382 = vadd.xlane.f32.xlu0 %v283_v42  ;;  %v241_v35 = vmul.f32 0.6931472, %v777_v28  ;;  %v779_v43 = vpop.eup %778  ;;  %v150_v50 = vsub.f32 1.0, %v134_v6  ;;  %v285_v39 = vmul.f32 %v269_v27, %v243_v40  ;;  %v227_v25 = vmax.f32 %v1099_v12, 1e-08 }
  0x5e   :  { %380 = vadd.xlane.f32.xlu1 %v282_v11  ;;  %v245_v51 = vmul.f32 0.6931472, %v779_v43  ;;  %v781_v46 = vpop.eup %780  ;;  %786 = vlog2.f32 %v226_v45  ;;  %v181_v54 = vmin.f32 %v165_v48, 1.0  ;;  %v1110_v55 = vsel %vm196_vm12, %v1072_v58, %v180_v16 }
  0x5f   :  { %v284_v44 = vmul.f32 %v268_v26, %v241_v35  ;;  %v151_v1 = vsub.f32 1.0, %v135_v49  ;;  %v166_v59 = vadd.f32 0.05, %v150_v50  ;;  %v333_v24 = vmul.f32 %v285_v39, %v958_v4 }
  0x60   :  { %v783_v60 = vpop.eup %782  ;;  %v286_v61 = vmul.f32 %v270_v53, %v245_v51  ;;  %v247_v56 = vmul.f32 0.6931472, %v781_v46  ;;  %v271_v62 = vsub.f32 1.0, %v1057_v31  ;;  %788 = vlog2.f32 %v227_v25 }
  0x61   :  { %346 = vadd.xlane.f32.xlu0 %v329_v20  ;;  %v332_v63 = vmul.f32 %v284_v44, %v960_v5  ;;  %v331_v5 = vmul.f32 %v283_v42, %v952_v2  ;;  %v213_v9 = vsel %vm197_vm13, %v1077_v57, %v181_v54  ;;  %v228_v58 = vmax.f32 %v1110_v55, 1e-08 }
  0x62   :  { %384 = vadd.xlane.f32.xlu1 %v284_v44  ;;  %v167_v10 = vadd.f32 0.05, %v151_v1  ;;  %v182_v11 = vmin.f32 %v166_v59, 1.0  ;;  %v334_v2 = vmul.f32 %v286_v61, %v966_v8  ;;  %v287_v42 = vmul.f32 %v271_v62, %v247_v56 }
  0x63   :  { %v785_v13 = vpop.eup %784  ;;  %v249_v4 = vmul.f32 0.6931472, %v783_v60  ;;  %v272_v18 = vsub.f32 1.0, %v1069_v52  ;;  %v229_v31 = vmax.f32 %v213_v9, 1e-08  ;;  %790 = vlog2.f32 %v228_v58 }
  0x64   :  { %v183_v19 = vmin.f32 %v167_v10, 1.0  ;;  %v214_v57 = vsel %vm198_vm14, %v134_v6, %v182_v11  ;;  %v335_v47 = vmul.f32 %v287_v42, %v964_v7  ;;  %v251_v26 = vmul.f32 0.6931472, %v785_v13 }
  0x65   :  { %348 = vadd.xlane.f32.xlu0 %v330_v38  ;;  %v288_v21 = vmul.f32 %v272_v18, %v249_v4  ;;  %v273_v8 = vsub.f32 1.0, %v1080_v17  ;;  %792 = vlog2.f32 %v229_v31  ;;  %v230_v52 = vmax.f32 %v214_v57, 1e-08 }
  0x66   :  { %344 = vadd.xlane.f32.xlu1 %v328_v0  ;;  %v215_v28 = vsel %vm199_vm15, %v135_v49, %v183_v19  ;;  %v274_v6 = vsub.f32 1.0, %v1090_v41  ;;  %v275_v40 = vsub.f32 1.0, %v1099_v12  ;;  %v276_v41 = vsub.f32 1.0, %v1110_v55 }
  0x67   :  { %v336_v33 = vmul.f32 %v288_v21, %v972_v15  ;;  %v289_v34 = vmul.f32 %v273_v8, %v251_v26  ;;  %v231_v35 = vmax.f32 %v215_v28, 1e-08  ;;  %794 = vlog2.f32 %v230_v52 }
  0x68   :  { %v787_v20 = vpop.eup %786  ;;  %v277_v49 = vsub.f32 1.0, %v213_v9  ;;  %v279_v25 = vsub.f32 1.0, %v215_v28  ;;  %vm611_vm0 = vcmask 130112   ;;  %vm618_vm1 = vcmask 195712  }
  0x69   :  { %352 = vadd.xlane.f32.xlu0 %v332_v63  ;;  %v253_v3 = vmul.f32 0.6931472, %v787_v20  ;;  %v337_v7 = vmul.f32 %v289_v34, %v970_v14  ;;  %796 = vlog2.f32 %v231_v35  ;;  %vm625_vm2 = vcmask 261312  }
  0x6a   :  { %350 = vadd.xlane.f32.xlu1 %v331_v5  ;;  %v789_v32 = vpop.eup %788  ;;  %vm632_vm3 = vcmask 326912   ;;  %vm639_vm4 = vcmask 392512   ;;  %vm646_vm5 = vcmask 458112   ;;  %vm653_vm6 = vcmask 523712  }
  0x6b   :  { %v290_v38 = vmul.f32 %v274_v6, %v253_v3  ;;  %v255_v17 = vmul.f32 0.6931472, %v789_v32  ;;  %vm660_vm7 = vcmask 589312   ;;  %vm667_vm8 = vcmask 654912  }
  0x6c   :  { %vm674_vm9 = vcmask 720512   ;;  %vm681_vm10 = vcmask 786112   ;;  %vm688_vm11 = vcmask 851712   ;;  %vm695_vm12 = vcmask 917312  }
  0x6d   :  { %354 = vadd.xlane.f32.xlu0 %v333_v24  ;;  %v791_v27 = vpop.eup %790  ;;  %v338_v15 = vmul.f32 %v290_v38, %v978_v23  ;;  %v291_v43 = vmul.f32 %v275_v40, %v255_v17  ;;  %v278_v23 = vsub.f32 1.0, %v214_v57  ;;  %v600_v40 = vlaneseq }
  0x6e   :  { %386 = vadd.xlane.f32.xlu1 %v285_v39  ;;  %v257_v44 = vmul.f32 0.6931472, %v791_v27  ;;  %vm702_vm13 = vcmask 982912   ;;  %vm709_vm14 = vcmask 1048512  }
  0x6f   :  { %v793_v45 = vpop.eup %792  ;;  %v339_v48 = vmul.f32 %v291_v43, %v976_v22 }
  0x70   :  { %v292_v14 = vmul.f32 %v276_v41, %v257_v44  ;;  %v259_v16 = vmul.f32 0.6931472, %v793_v45 }
  0x71   :  { %356 = vadd.xlane.f32.xlu0 %v334_v2  ;;  %v795_v50 = vpop.eup %794 }
  0x72   :  { %388 = vadd.xlane.f32.xlu1 %v286_v61  ;;  %v340_v12 = vmul.f32 %v292_v14, %v984_v30  ;;  %v293_v0 = vmul.f32 %v277_v49, %v259_v16  ;;  %v261_v63 = vmul.f32 0.6931472, %v795_v50  ;;  %v1160_v16 = vand.u32 127, %v600_v40 }
  0x73   :  { %v797_v39 = vpop.eup %796 }
  0x74   :  { %v341_v51 = vmul.f32 %v293_v0, %v982_v29  ;;  %v294_v53 = vmul.f32 %v278_v23, %v261_v63  ;;  %v263_v46 = vmul.f32 0.6931472, %v797_v39 }
  0x75   :  { %358 = vadd.xlane.f32.xlu0 %v335_v47 }
  0x76   :  { %390 = vadd.xlane.f32.xlu1 %v287_v42  ;;  %v342_v22 = vmul.f32 %v294_v53, %v990_v37  ;;  %v295_v54 = vmul.f32 %v279_v25, %v263_v46  ;;  %v606_v46 = vadd.s32 4294967288, %v1160_v16 }
  0x78   :  { %v343_v30 = vmul.f32 %v295_v54, %v988_v36 }
  0x79   :  { %360 = vadd.xlane.f32.xlu0 %v336_v33 }
  0x7a   :  { %392 = vadd.xlane.f32.xlu1 %v288_v21 }
  0x7d   :  { %362 = vadd.xlane.f32.xlu0 %v337_v7 }
  0x7e   :  { %394 = vadd.xlane.f32.xlu1 %v289_v34 }
  0x81   :  { %364 = vadd.xlane.f32.xlu0 %v338_v15 }
  0x82   :  { %396 = vadd.xlane.f32.xlu1 %v290_v38 }
  0x85   :  { %366 = vadd.xlane.f32.xlu0 %v339_v48 }
  0x86   :  { %398 = vadd.xlane.f32.xlu1 %v291_v43 }
  0x89   :  { %368 = vadd.xlane.f32.xlu0 %v340_v12 }
  0x8a   :  { %400 = vadd.xlane.f32.xlu1 %v292_v14 }
  0x8d   :  { %370 = vadd.xlane.f32.xlu0 %v341_v51 }
  0x8e   :  { %402 = vadd.xlane.f32.xlu1 %v293_v0 }
  0x91   :  { %372 = vadd.xlane.f32.xlu0 %v342_v22 }
  0x92   :  { %404 = vadd.xlane.f32.xlu1 %v294_v53  ;;  %v1164_v53 = vshrl.u32 %v600_v40, 7 }
  0x95   :  { %374 = vadd.xlane.f32.xlu0 %v343_v30  ;;  %v613_v30 = vadd.s32 4294967280, %v1160_v16 }
  0x96   :  { %406 = vadd.xlane.f32.xlu1 %v295_v54 }
  0xb7   :  { %v297_v55 = vpop.xlane.xlu0 %296  ;;  %v301_v1 = vpop.xlane.xlu1 %300 }
  0xb8   :  { %v426_v11 = vsub.f32 128.0, %v301_v1  ;;  %v424_v42 = vsub.f32 128.0, %v297_v55  ;;  %v410_v31 = vadd.f32 1e-08, %v301_v1  ;;  %v408_v21 = vadd.f32 1e-08, %v297_v55 }
  0xba   :  { %v442_v19 = vadd.f32 1e-08, %v426_v11  ;;  %v440_v26 = vadd.f32 1e-08, %v424_v42 }
  0xbb   :  { %v299_v59 = vpop.xlane.xlu0 %298  ;;  %v303_v5 = vpop.xlane.xlu1 %302 }
  0xbc   :  { %v425_v10 = vsub.f32 128.0, %v299_v59  ;;  %v409_v4 = vadd.f32 1e-08, %v299_v59  ;;  %v427_v8 = vsub.f32 128.0, %v303_v5  ;;  %v522_v52 = vmul.f32 %v442_v19, %v410_v31 }
  0xbd   :  { %v520_v6 = vmul.f32 %v440_v26, %v408_v21  ;;  %v411_v35 = vadd.f32 1e-08, %v303_v5 }
  0xbe   :  { %v441_v18 = vadd.f32 1e-08, %v425_v10  ;;  %v443_v7 = vadd.f32 1e-08, %v427_v8 }
  0xbf   :  { %v305_v29 = vpop.xlane.xlu0 %304  ;;  %v307_v60 = vpop.xlane.xlu1 %306 }
  0xc0   :  { %v428_v57 = vsub.f32 128.0, %v305_v29  ;;  %v521_v28 = vmul.f32 %v441_v18, %v409_v4  ;;  %v412_v32 = vadd.f32 1e-08, %v305_v29  ;;  %v429_v38 = vsub.f32 128.0, %v307_v60 }
  0xc1   :  { %v523_v43 = vmul.f32 %v443_v7, %v411_v35  ;;  %v1156_v44 = vadd.f32 1e-08, %v307_v60  ;;  %v627_v60 = vadd.s32 4294967264, %v1160_v16 }
  0xc2   :  { %v444_v33 = vadd.f32 1e-08, %v428_v57  ;;  %798 = vrcp.f32 %v521_v28  ;;  %v1158_v41 = vadd.f32 1e-08, %v429_v38  ;;  %v620_v57 = vadd.s32 4294967272, %v1160_v16 }
  0xc3   :  { %v1136_v24 = vpop.xlane.xlu0 %308  ;;  %v1138_v61 = vpop.xlane.xlu1 %310  ;;  %800 = vrcp.f32 %v522_v52  ;;  %v616_v28 = vsub.s32 %v613_v30, %v1164_v53  ;;  %v630_v38 = vsub.s32 %v627_v60, %v1164_v53 }
  0xc4   :  { %v524_v17 = vmul.f32 %v444_v33, %v412_v32  ;;  %802 = vrcp.f32 %v520_v6  ;;  %v525_v0 = vmul.f32 %v1158_v41, %v1156_v44 }
  0xc6   :  { %804 = vrcp.f32 %v524_v17 }
  0xc7   :  { %v1140_v56 = vpop.xlane.xlu0 %312  ;;  %v1142_v37 = vpop.xlane.xlu1 %314  ;;  %806 = vrcp.f32 %v523_v43 }
  0xc8   :  { %808 = vrcp.f32 %v525_v0 }
  0xcb   :  { %v1144_v62 = vpop.xlane.xlu0 %316  ;;  %v1146_v36 = vpop.xlane.xlu1 %318 }
  0xcc   :  { %v799_v51 = vpop.eup %798 }
  0xcd   :  { %v801_v59 = vpop.eup %800 }
  0xcf   :  { %v1148_v9 = vpop.xlane.xlu0 %320  ;;  %v1150_v58 = vpop.xlane.xlu1 %322 }
  0xd3   :  { %v1152_v13 = vpop.xlane.xlu0 %324  ;;  %v1154_v2 = vpop.xlane.xlu1 %326 }
  0xe6   :  { %v379_v20 = vpop.xlane.xlu0 %378 }
  0xe7   :  { %v377_v47 = vpop.xlane.xlu1 %376 }
  0xea   :  { %v383_v34 = vpop.xlane.xlu0 %382 }
  0xeb   :  { %v381_v3 = vpop.xlane.xlu1 %380 }
  0xee   :  { %v347_v27 = vpop.xlane.xlu0 %346 }
  0xef   :  { %v473_v15 = vsub.f32 %v379_v20, %v347_v27  ;;  %v457_v45 = vmul.f32 %v441_v18, %v347_v27  ;;  %v385_v14 = vpop.xlane.xlu1 %384  ;;  %v803_v18 = vpop.eup %802  ;;  %v623_v27 = vsub.s32 %v620_v57, %v1164_v53  ;;  %v414_v57 = vadd.f32 1e-08, %v1136_v24 }
  0xf0   :  { %v805_v52 = vpop.eup %804 }
  0xf1   :  { %v489_v48 = vmul.f32 %v473_v15, %v409_v4 }
  0xf2   :  { %v349_v49 = vpop.xlane.xlu0 %348 }
  0xf3   :  { %v505_v50 = vadd.f32 %v489_v48, %v457_v45  ;;  %v474_v12 = vsub.f32 %v381_v3, %v349_v49  ;;  %v458_v63 = vmul.f32 %v442_v19, %v349_v49  ;;  %v345_v39 = vpop.xlane.xlu1 %344  ;;  %v604_v3 = vsub.s32 %v1160_v16, %v1164_v53  ;;  %v807_v48 = vpop.eup %806 }
  0xf4   :  { %v472_v25 = vsub.f32 %v377_v47, %v345_v39  ;;  %v456_v5 = vmul.f32 %v440_v26, %v345_v39 }
  0xf5   :  { %v490_v23 = vmul.f32 %v474_v12, %v410_v31  ;;  %v539_v54 = vmul.f32 %v799_v51, %v505_v50  ;;  %v609_v31 = vsub.s32 %v606_v46, %v1164_v53 }
  0xf6   :  { %v353_v22 = vpop.xlane.xlu0 %352  ;;  %v488_v29 = vmul.f32 %v472_v25, %v408_v21 }
  0xf7   :  { %v506_v55 = vadd.f32 %v490_v23, %v458_v63  ;;  %v476_v1 = vsub.f32 %v385_v14, %v353_v22  ;;  %v460_v11 = vmul.f32 %v444_v33, %v353_v22  ;;  %v351_v4 = vpop.xlane.xlu1 %350  ;;  %v569_v8 = vsub.f32 0.0, %v539_v54  ;;  %v809_v22 = vpop.eup %808 }
  0xf8   :  { %v504_v19 = vadd.f32 %v488_v29, %v456_v5  ;;  %v475_v20 = vsub.f32 %v383_v34, %v351_v4  ;;  %v433_v29 = vsub.f32 128.0, %v1142_v37 }
  0xf9   :  { %v541_v10 = vmul.f32 %v801_v59, %v506_v55  ;;  %v492_v42 = vmul.f32 %v476_v1, %v412_v32  ;;  %v459_v32 = vmul.f32 %v443_v7, %v351_v4  ;;  %v610_v14 = vrot.slane %v569_v8, %v609_v31 }
  0xfa   :  { %v355_v47 = vpop.xlane.xlu0 %354  ;;  %v537_v33 = vmul.f32 %v803_v18, %v504_v19  ;;  %v491_v6 = vmul.f32 %v475_v20, %v411_v35  ;;  %v634_v7 = vadd.s32 4294967256, %v1160_v16  ;;  %v431_v55 = vsub.f32 128.0, %v1138_v61 }
  0xfb   :  { %v570_v26 = vsub.f32 0.0, %v541_v10  ;;  %v508_v21 = vadd.f32 %v492_v42, %v460_v11  ;;  %v387_v40 = vpop.xlane.xlu1 %386  ;;  %v461_v0 = vmul.f32 %v1158_v41, %v355_v47  ;;  %v430_v59 = vsub.f32 128.0, %v1136_v24 }
  0xfc   :  { %v568_v34 = vsub.f32 0.0, %v537_v33  ;;  %v507_v15 = vadd.f32 %v491_v6, %v459_v32  ;;  %v477_v43 = vsub.f32 %v387_v40, %v355_v47  ;;  %v637_v41 = vsub.s32 %v634_v7, %v1164_v53 }
  0xfd   :  { %v545_v17 = vmul.f32 %v805_v52, %v508_v21  ;;  %v617_v49 = vrot.slane %v570_v26, %v616_v28  ;;  %v432_v42 = vsub.f32 128.0, %v1140_v56  ;;  %v415_v18 = vadd.f32 1e-08, %v1138_v61 }
  0xfe   :  { %v1176_v45 = vpop.xlane.xlu0 %356  ;;  %v605_v35 = vrot.slane %v568_v34, %v604_v3  ;;  %v543_v12 = vmul.f32 %v807_v48, %v507_v15  ;;  %v493_v63 = vmul.f32 %v477_v43, %v1156_v44  ;;  %v1197_v31 = vadd.f32 1e-08, %v431_v55 }
  0xff   :  { %v572_v50 = vsub.f32 0.0, %v545_v17  ;;  %v1181_v23 = vpop.xlane.xlu1 %388  ;;  %v446_v20 = vadd.f32 1e-08, %v430_v59  ;;  %v435_v47 = vsub.f32 128.0, %v1146_v36  ;;  %v417_v28 = vadd.f32 1e-08, %v1142_v37 }
 0x100   :  { %v612_v39 = vsel %vm611_vm0, %v610_v14, %v605_v35  ;;  %v571_v51 = vsub.f32 0.0, %v543_v12  ;;  %v509_v46 = vadd.f32 %v493_v63, %v461_v0  ;;  %v1202_v26 = vadd.f32 1e-08, %v433_v29 }
 0x101   :  { %v631_v54 = vrot.slane %v572_v50, %v630_v38  ;;  %v619_v30 = vsel %vm618_vm1, %v617_v49, %v612_v39  ;;  %v434_v21 = vsub.f32 128.0, %v1144_v62  ;;  %v416_v61 = vadd.f32 1e-08, %v1140_v56 }
 0x102   :  { %v1184_v25 = vpop.xlane.xlu0 %358  ;;  %v624_v1 = vrot.slane %v571_v51, %v623_v27  ;;  %v547_v44 = vmul.f32 %v809_v22, %v509_v46  ;;  %v448_v33 = vadd.f32 1e-08, %v432_v42  ;;  %v437_v32 = vsub.f32 128.0, %v1150_v58 }
 0x103   :  { %v1190_v5 = vpop.xlane.xlu1 %390  ;;  %v527_v24 = vmul.f32 %v1197_v31, %v415_v18  ;;  %v436_v6 = vsub.f32 128.0, %v1148_v9  ;;  %v526_v38 = vmul.f32 %v446_v20, %v414_v57  ;;  %v419_v17 = vadd.f32 1e-08, %v1146_v36 }
 0x104   :  { %v626_v60 = vsel %vm625_vm2, %v624_v1, %v619_v30  ;;  %v573_v10 = vsub.f32 0.0, %v547_v44  ;;  %v1212_v37 = vadd.f32 1e-08, %v435_v47  ;;  %v1215_v40 = vadd.s32 4294967248, %v1160_v16 }
 0x105   :  { %v633_v4 = vsel %vm632_vm3, %v631_v54, %v626_v60  ;;  %v529_v27 = vmul.f32 %v1202_v26, %v417_v28  ;;  %v418_v56 = vadd.f32 1e-08, %v1144_v62  ;;  %v450_v15 = vadd.f32 1e-08, %v434_v21 }
 0x106   :  { %v1193_v11 = vpop.xlane.xlu0 %360  ;;  %v638_v19 = vrot.slane %v573_v10, %v637_v41  ;;  %v1220_v43 = vadd.s32 4294967240, %v1160_v16  ;;  %v528_v14 = vmul.f32 %v448_v33, %v416_v61  ;;  %v1223_v49 = vadd.f32 1e-08, %v1150_v58 }
 0x107   :  { %v393_v8 = vpop.xlane.xlu1 %392  ;;  %v1225_v36 = vadd.f32 1e-08, %v437_v32  ;;  %810 = vrcp.f32 %v527_v24  ;;  %v420_v50 = vadd.f32 1e-08, %v1148_v9  ;;  %v1228_v7 = vadd.f32 1e-08, %v436_v6 }
 0x108   :  { %v1205_v52 = vsel %vm639_vm4, %v638_v19, %v633_v4  ;;  %v438_v35 = vsub.f32 128.0, %v1152_v13  ;;  %812 = vrcp.f32 %v526_v38  ;;  %v531_v62 = vmul.f32 %v1212_v37, %v419_v17 }
 0x109   :  { %v644_v12 = vsub.s32 %v1215_v40, %v1164_v53  ;;  %v478_v0 = vsub.f32 %v1181_v23, %v1176_v45  ;;  %814 = vrcp.f32 %v529_v27  ;;  %v530_v63 = vmul.f32 %v450_v15, %v418_v56 }
 0x10a   :  { %v363_v3 = vpop.xlane.xlu0 %362  ;;  %v651_v39 = vsub.s32 %v1220_v43, %v1164_v53  ;;  %v479_v9 = vsub.f32 %v1190_v5, %v1184_v25  ;;  %816 = vrcp.f32 %v528_v14  ;;  %v533_v46 = vmul.f32 %v1225_v36, %v1223_v49 }
 0x10b   :  { %v395_v34 = vpop.xlane.xlu1 %394  ;;  %v480_v22 = vsub.f32 %v393_v8, %v1193_v11  ;;  %v532_v30 = vmul.f32 %v1228_v7, %v420_v50  ;;  %v439_v23 = vsub.f32 128.0, %v1154_v2  ;;  %v1246_v55 = vadd.f32 1e-08, %v1152_v13 }
 0x10c   :  { %v481_v54 = vsub.f32 %v395_v34, %v363_v3  ;;  %v1248_v1 = vadd.f32 1e-08, %v438_v35  ;;  %818 = vrcp.f32 %v531_v62  ;;  %v494_v41 = vmul.f32 %v478_v0, %v414_v57 }
 0x10d   :  { %v1251_v44 = vadd.s32 4294967232, %v1160_v16  ;;  %820 = vrcp.f32 %v530_v63  ;;  %v1254_v29 = vadd.f32 1e-08, %v1154_v2  ;;  %v495_v60 = vmul.f32 %v479_v9, %v415_v18 }
 0x10e   :  { %v365_v48 = vpop.xlane.xlu0 %364  ;;  %822 = vrcp.f32 %v533_v46  ;;  %v462_v13 = vmul.f32 %v446_v20, %v1176_v45  ;;  %v496_v4 = vmul.f32 %v480_v22, %v416_v61  ;;  %v497_v19 = vmul.f32 %v481_v54, %v417_v28 }
 0x10f   :  { %v397_v58 = vpop.xlane.xlu1 %396  ;;  %824 = vrcp.f32 %v532_v30  ;;  %v1257_v47 = vadd.f32 1e-08, %v439_v23  ;;  %v534_v57 = vmul.f32 %v1248_v1, %v1246_v55  ;;  %v463_v8 = vmul.f32 %v1197_v31, %v1184_v25 }
 0x110   :  { %v482_v59 = vsub.f32 %v397_v58, %v365_v48  ;;  %v510_v21 = vadd.f32 %v494_v41, %v462_v13  ;;  %v464_v2 = vmul.f32 %v448_v33, %v1193_v11  ;;  %v465_v18 = vmul.f32 %v1202_v26, %v363_v3 }
 0x111   :  { %v811_v6 = vpop.eup %810  ;;  %v511_v45 = vadd.f32 %v495_v60, %v463_v8  ;;  %v1266_v20 = vadd.s32 4294967224, %v1160_v16  ;;  %v658_v27 = vsub.s32 %v1251_v44, %v1164_v53  ;;  %v466_v14 = vmul.f32 %v450_v15, %v365_v48 }
 0x112   :  { %v367_v51 = vpop.xlane.xlu0 %366  ;;  %v498_v32 = vmul.f32 %v482_v59, %v418_v56  ;;  %v813_v34 = vpop.eup %812  ;;  %v512_v25 = vadd.f32 %v496_v4, %v464_v2  ;;  %v513_v31 = vadd.f32 %v497_v19, %v465_v18  ;;  %v535_v26 = vmul.f32 %v1257_v47, %v1254_v29 }
 0x113   :  { %v399_v5 = vpop.xlane.xlu1 %398  ;;  %v815_v11 = vpop.eup %814  ;;  %v1273_v3 = vadd.s32 4294967216, %v1160_v16  ;;  %v467_v33 = vmul.f32 %v1212_v37, %v367_v51  ;;  %826 = vrcp.f32 %v534_v57  ;;  %v549_v35 = vmul.f32 %v813_v34, %v510_v21 }
 0x114   :  { %v483_v10 = vsub.f32 %v399_v5, %v367_v51  ;;  %v514_v62 = vadd.f32 %v498_v32, %v466_v14  ;;  %v551_v63 = vmul.f32 %v811_v6, %v511_v45  ;;  %v665_v15 = vsub.s32 %v1266_v20, %v1164_v53 }
 0x115   :  { %v555_v37 = vmul.f32 %v815_v11, %v513_v31  ;;  %v683_v23 = vadd.s32 4294967200, %v1160_v16  ;;  %828 = vrcp.f32 %v535_v26  ;;  %v574_v60 = vsub.f32 0.0, %v549_v35 }
 0x116   :  { %v369_v42 = vpop.xlane.xlu0 %368  ;;  %v499_v28 = vmul.f32 %v483_v10, %v419_v17  ;;  %v817_v17 = vpop.eup %816  ;;  %v575_v19 = vsub.f32 0.0, %v551_v63  ;;  %v697_v34 = vadd.s32 4294967184, %v1160_v16 }
 0x117   :  { %v401_v24 = vpop.xlane.xlu1 %400  ;;  %v468_v0 = vmul.f32 %v1228_v7, %v369_v42  ;;  %v819_v22 = vpop.eup %818  ;;  %v553_v54 = vmul.f32 %v817_v17, %v512_v25  ;;  %v672_v7 = vsub.s32 %v1273_v3, %v1164_v53  ;;  %v577_v18 = vsub.f32 0.0, %v555_v37 }
 0x118   :  { %v484_v61 = vsub.f32 %v401_v24, %v369_v42  ;;  %v515_v48 = vadd.f32 %v499_v28, %v467_v33  ;;  %v821_v30 = vpop.eup %820  ;;  %v690_v42 = vadd.s32 4294967192, %v1160_v16  ;;  %v645_v28 = vrot.slane %v574_v60, %v644_v12 }
 0x119   :  { %v823_v5 = vpop.eup %822  ;;  %v557_v10 = vmul.f32 %v821_v30, %v514_v62  ;;  %v576_v2 = vsub.f32 0.0, %v553_v54  ;;  %v652_v31 = vrot.slane %v575_v19, %v651_v39  ;;  %v666_v40 = vrot.slane %v577_v18, %v665_v15 }
 0x11a   :  { %v371_v38 = vpop.xlane.xlu0 %370  ;;  %v500_v56 = vmul.f32 %v484_v61, %v420_v50  ;;  %v676_v50 = vadd.s32 4294967208, %v1160_v16  ;;  %v825_v4 = vpop.eup %824  ;;  %v559_v57 = vmul.f32 %v819_v22, %v515_v48  ;;  %v704_v3 = vadd.s32 4294967176, %v1160_v16 }
 0x11b   :  { %v403_v58 = vpop.xlane.xlu1 %402  ;;  %v469_v41 = vmul.f32 %v1225_v36, %v371_v38  ;;  %v578_v61 = vsub.f32 0.0, %v557_v10  ;;  %v647_v43 = vsel %vm646_vm5, %v645_v28, %v1205_v52  ;;  %v700_v62 = vsub.s32 %v697_v34, %v1164_v53 }
 0x11c   :  { %v485_v9 = vsub.f32 %v403_v58, %v371_v38  ;;  %v516_v51 = vadd.f32 %v500_v56, %v468_v0  ;;  %v679_v32 = vsub.s32 %v676_v50, %v1164_v53  ;;  %v693_v38 = vsub.s32 %v690_v42, %v1164_v53 }
 0x11d   :  { %v579_v14 = vsub.f32 0.0, %v559_v57  ;;  %v673_v39 = vrot.slane %v578_v61, %v672_v7  ;;  %v654_v44 = vsel %vm653_vm6, %v652_v31, %v647_v43  ;;  %v707_v52 = vsub.s32 %v704_v3, %v1164_v53 }
 0x11e   :  { %v373_v46 = vpop.xlane.xlu0 %372  ;;  %v501_v59 = vmul.f32 %v485_v9, %v1223_v49  ;;  %v561_v36 = vmul.f32 %v825_v4, %v516_v51  ;;  %v686_v49 = vsub.s32 %v683_v23, %v1164_v53 }
 0x11f   :  { %v405_v13 = vpop.xlane.xlu1 %404  ;;  %v470_v45 = vmul.f32 %v1248_v1, %v373_v46  ;;  %v827_v1 = vpop.eup %826 }
 0x120   :  { %v517_v8 = vadd.f32 %v501_v59, %v469_v41  ;;  %v486_v21 = vsub.f32 %v405_v13, %v373_v46  ;;  %v580_v12 = vsub.f32 0.0, %v561_v36  ;;  %v829_v63 = vpop.eup %828 }
 0x122   :  { %v375_v24 = vpop.xlane.xlu0 %374  ;;  %v563_v6 = vmul.f32 %v823_v5, %v517_v8  ;;  %v502_v20 = vmul.f32 %v486_v21, %v1246_v55  ;;  %v659_v55 = vrot.slane %v576_v2, %v658_v27  ;;  %v680_v27 = vrot.slane %v579_v14, %v679_v32 }
 0x123   :  { %v407_v25 = vpop.xlane.xlu1 %406  ;;  %v471_v17 = vmul.f32 %v1257_v47, %v375_v24  ;;  %v687_v15 = vrot.slane %v580_v12, %v686_v49 }
 0x124   :  { %v518_v11 = vadd.f32 %v502_v20, %v470_v45  ;;  %v487_v26 = vsub.f32 %v407_v25, %v375_v24  ;;  %v581_v33 = vsub.f32 0.0, %v563_v6  ;;  %v661_v16 = vsel %vm660_vm7, %v659_v55, %v654_v44 }
 0x126   :  { %v565_v56 = vmul.f32 %v827_v1, %v518_v11  ;;  %v503_v35 = vmul.f32 %v487_v26, %v1254_v29  ;;  %v668_v29 = vsel %vm667_vm8, %v666_v40, %v661_v16  ;;  %v694_v47 = vrot.slane %v581_v33, %v693_v38 }
 0x127   :  { %v675_v9 = vsel %vm674_vm9, %v673_v39, %v668_v29 }
 0x128   :  { %v582_v0 = vsub.f32 0.0, %v565_v56  ;;  %v519_v58 = vadd.f32 %v503_v35, %v471_v17  ;;  %v682_v54 = vsel %vm681_vm10, %v680_v27, %v675_v9 }
 0x129   :  { %v689_v37 = vsel %vm688_vm11, %v687_v15, %v682_v54 }
 0x12a   :  { %v567_v48 = vmul.f32 %v829_v63, %v519_v58  ;;  %v701_v46 = vrot.slane %v582_v0, %v700_v62  ;;  %v696_v50 = vsel %vm695_vm12, %v694_v47, %v689_v37 }
 0x12c   :  { %v583_v22 = vsub.f32 0.0, %v567_v48  ;;  %v703_v30 = vsel %vm702_vm13, %v701_v46, %v696_v50 }
 0x12e   :  { %v708_v51 = vrot.slane %v583_v22, %v707_v52 }
 0x130   :  { %v710_v7 = vsel %vm709_vm14, %v708_v51, %v703_v30 }
 0x131   :  { %712 = vst [vmem:[#allocation7] sm:$0x1] %v710_v7 }
 0x132   :  { %885 = shalt.err (!%p882_p6)
}
 0x133   :  { %s886_s13 = scalar_lea.hbm %s1326_s2, 16 }
 0x134   :  { %p887_p7 = scmp.ne.s32.totalorder %s1326_s2, %s886_s13  ;;  %p890_p8 = scmp.lt.u32.totalorder %s886_s13, %s1326_s2 }
 0x136   :  { %p892_p9 = pnand %p890_p8, %p887_p7 }
 0x138   :  { %895 = shalt.err (!%p892_p9)
}
 0x139   :  { %722 = dma.vmem_to_hbm [thread:$0]  %s720_s8, 16, %s1326_s2, [#allocation4]  }
 0x13a   :  { %900 = dma.done.wait [#allocation4], 16  }
 0x13b   :  { %901 = vsyncadd [#allocation4], 4294967280 }
 0x13c   :  { %726 = vsyncpa [#allocation3], 1 }
 0x13d   :  { %727 = vsyncpa [#allocation6], 1 }
 0x13e   :  { %728 = vsyncpa [#allocation4], 1 }

</bundles_post_ra>
